<compile_context>
chip_gen: v6e
topology: v6e:2x2x1
jax: 0.10.0
libtpu: 0.0.40
codegen_flags: <defaults>
</compile_context>

<pallas_src>
import functools

import jax
import jax.numpy as jnp
from jax.experimental import pallas as pl
from jax.experimental.pallas import tpu as pltpu


def _gdn_kernel(gamma_ref, beta_ref, x_ref, o_ref, *, channels, use_mxu):
    # gamma/beta are pre-clamped in the wrapper (hoisted out of the grid loop).
    x = x_ref[...]                          # (C, T)
    xabs = jnp.abs(x)
    beta = beta_ref[...]                    # (C, 1)

    if use_mxu:
        # Channel-mixing 1x1 conv == matmul on the MXU.
        denom = jnp.dot(gamma_ref[...], xabs,
                        preferred_element_type=jnp.float32) + beta
    else:
        # Small channel count: a CxC contraction would waste the MXU and its
        # latency, so unroll the channel mix as C broadcast-FMA VPU ops.
        gamma = gamma_ref[...]              # (C, C)
        denom = beta
        for j in range(channels):
            denom = denom + gamma[:, j:j + 1] * xabs[j:j + 1, :]

    # denom > 0 is guaranteed: gamma >= 0, |x| >= 0, beta >= beta_min > 0.
    # Keep the exact divide (approx reciprocal may miss the 1e-5 tolerance).
    o_ref[...] = (x / denom).astype(o_ref.dtype)


def _vmem_limit_bytes():
    """Scoped VMEM limit: generous, but with headroom below physical VMEM."""
    try:
        cap = pltpu.get_tpu_info().vmem_capacity_bytes
    except Exception:
        cap = 128 << 20
    # v5e/v6e: ~96 MiB of 128 MiB.  v7x: ~48 MiB of 64 MiB.
    return int(min(100 << 20, cap * 3 // 4))


def _choose_tile(hw, c, n, itemsize, budget_bytes, min_grid_steps=8):
    """Largest lane-aligned tile dividing HW that fits the VMEM budget and
    (when possible) keeps enough grid steps to feed both v7x TensorCores."""
    cands = sorted({d for d in range(128, hw + 1, 128) if hw % d == 0} | {hw})

    def step_bytes(t):
        # 2x double-buffered (x block + out block) plus resident gamma/beta.
        return 4 * c * t * itemsize + (c * c + c) * itemsize

    fitting = [t for t in cands if step_bytes(t) <= budget_bytes] or [cands[0]]
    wide = [t for t in fitting if n * (hw // t) >= min_grid_steps]
    return max(wide) if wide else max(fitting)


def simplified_gdn(x, gamma, beta, *, beta_min=1e-6, tile=None):
    """x: (N, C, H, W); gamma: (C, C) or (C, C, 1, 1); beta: (C,)."""
    N, C, H, W = x.shape
    HW = H * W
    itemsize = jnp.dtype(x.dtype).itemsize

    # Hoist the parameter clamps (forward semantics of _clamp_min) out of the
    # kernel: they depend only on the parameters, so clamping per grid step
    # would be redundant VPU work.
    gamma_c = jnp.maximum(gamma.reshape(C, C).astype(jnp.float32), 0.0)
    beta_c = jnp.maximum(beta.reshape(C, 1).astype(jnp.float32), beta_min)

    vmem_limit = _vmem_limit_bytes()
    if tile is None:
        tile = _choose_tile(HW, C, N, itemsize,
                            budget_bytes=(vmem_limit * 3) // 5)
    assert HW % tile == 0, "tile must divide H*W"
    assert tile % 128 == 0 or tile == HW, "tile must be lane-aligned or full extent"

    x_flat = x.reshape(N, C, HW)
    grid = (N, HW // tile)
    use_mxu = C >= 16

    kernel = functools.partial(_gdn_kernel, channels=C, use_mxu=use_mxu)

    out = pl.pallas_call(
        kernel,
        out_shape=jax.ShapeDtypeStruct((N, C, HW), x.dtype),
        grid_spec=pltpu.PrefetchScalarGridSpec(
            num_scalar_prefetch=0,
            grid=grid,
            in_specs=[
                pl.BlockSpec((C, C), lambda n, t: (0, 0)),   # gamma: VMEM-resident
                pl.BlockSpec((C, 1), lambda n, t: (0, 0)),   # beta:  VMEM-resident
                pl.BlockSpec((pl.Squeezed(), C, tile), lambda n, t: (n, 0, t)),
            ],
            out_specs=pl.BlockSpec((pl.Squeezed(), C, tile), lambda n, t: (n, 0, t)),
        ),
        compiler_params=pltpu.CompilerParams(
            dimension_semantics=("parallel", "parallel"),
            vmem_limit_bytes=vmem_limit,
        ),
    )(gamma_c, beta_c, x_flat)

    return out.reshape(N, C, H, W)


def _reference(x, gamma, beta, beta_min=1e-6):
    g = jnp.maximum(gamma, 0.0)
    b = jnp.maximum(beta, beta_min)
    xa = jnp.abs(x)
    # conv2d with a 1x1 kernel: denom[n,i,h,w] = b[i] + sum_j g[i,j]*|x[n,j,h,w]|
    denom = jnp.einsum("ij,njhw->nihw", g, xa) + b[None, :, None, None]
    return x / denom


if __name__ == "__main__":
    N, C, H, W = 2, 4, 16, 16
    gamma_init = 0.1
    beta_min = 1e-6

    # Deterministic parameter init, mirroring SimplifiedGDN.__init__.
    gamma = jnp.eye(C, dtype=jnp.float32) * gamma_init   # (C, C)  == CxCx1x1 conv kernel
    beta = jnp.ones((C,), dtype=jnp.float32)

    key = jax.random.PRNGKey(0)
    x = jax.random.normal(key, (N, C, H, W), dtype=jnp.float32)

    out = simplified_gdn(x, gamma, beta, beta_min=beta_min)
    out = jax.block_until_ready(out)

    ref = _reference(x, gamma, beta, beta_min)
    assert out.shape == (N, C, H, W)
    assert jnp.allclose(out, ref, atol=1e-5, rtol=1e-5), "mismatch vs reference"

    # TODO(synk): _ClampMin's custom gradient rule is training-only; forward clamp
    # semantics are fully reproduced above.
    print("KERNEL_OK")
</pallas_src>

<mosaic_0001>
module attributes {stable_mosaic.version = 11 : i64} {
  func.func @_gdn_kernel(%arg0: i32, %arg1: i32, %arg2: memref<4x4xf32, #tpu.memory_space<vmem>>, %arg3: memref<4x1xf32, #tpu.memory_space<vmem>>, %arg4: memref<1x4x256xf32, #tpu.memory_space<vmem>>, %arg5: memref<1x4x256xf32, #tpu.memory_space<vmem>>) attributes {dimension_semantics = [#tpu.dimension_semantics<parallel>, #tpu.dimension_semantics<parallel>], iteration_bounds = array<i64: 2, 1>, scalar_prefetch = 0 : i64, scratch_operands = 0 : i64, tpu.core_type = #tpu.core_type<tc>, window_params = [{pipeline_mode = #tpu.pipeline_mode<synchronous>, transform_indices = @transform_0, window_bounds = array<i64: 4, 4>}, {pipeline_mode = #tpu.pipeline_mode<synchronous>, transform_indices = @transform_1, window_bounds = array<i64: 4, 1>}, {transform_indices = @transform_2, window_bounds = array<i64: 1, 4, 256>}, {transform_indices = @transform_3, window_bounds = array<i64: 1, 4, 256>}]} {
    %c0 = arith.constant 0 : index
    %c0_0 = arith.constant 0 : index
    %c0_1 = arith.constant 0 : index
    %0 = vector.load %arg4[%c0, %c0_0, %c0_1] : memref<1x4x256xf32, #tpu.memory_space<vmem>>, vector<1x4x256xf32>
    %1 = vector.shape_cast %0 : vector<1x4x256xf32> to vector<4x256xf32>
    %2 = math.absf %1 : vector<4x256xf32>
    %c0_2 = arith.constant 0 : index
    %c0_3 = arith.constant 0 : index
    %3 = vector.load %arg3[%c0_2, %c0_3] : memref<4x1xf32, #tpu.memory_space<vmem>>, vector<4x1xf32>
    %c0_4 = arith.constant 0 : index
    %c0_5 = arith.constant 0 : index
    %4 = vector.load %arg2[%c0_4, %c0_5] : memref<4x4xf32, #tpu.memory_space<vmem>>, vector<4x4xf32>
    %5 = vector.extract_strided_slice %4 {offsets = [0, 0], sizes = [4, 1], strides = [1, 1]} : vector<4x4xf32> to vector<4x1xf32>
    %6 = vector.extract_strided_slice %2 {offsets = [0, 0], sizes = [1, 256], strides = [1, 1]} : vector<4x256xf32> to vector<1x256xf32>
    %7 = vector.broadcast %5 : vector<4x1xf32> to vector<4x256xf32>
    %8 = vector.broadcast %6 : vector<1x256xf32> to vector<4x256xf32>
    %9 = arith.mulf %7, %8 : vector<4x256xf32>
    %10 = vector.broadcast %3 : vector<4x1xf32> to vector<4x256xf32>
    %11 = arith.addf %10, %9 : vector<4x256xf32>
    %12 = vector.extract_strided_slice %4 {offsets = [0, 1], sizes = [4, 1], strides = [1, 1]} : vector<4x4xf32> to vector<4x1xf32>
    %13 = vector.extract_strided_slice %2 {offsets = [1, 0], sizes = [1, 256], strides = [1, 1]} : vector<4x256xf32> to vector<1x256xf32>
    %14 = vector.broadcast %12 : vector<4x1xf32> to vector<4x256xf32>
    %15 = vector.broadcast %13 : vector<1x256xf32> to vector<4x256xf32>
    %16 = arith.mulf %14, %15 : vector<4x256xf32>
    %17 = arith.addf %11, %16 : vector<4x256xf32>
    %18 = vector.extract_strided_slice %4 {offsets = [0, 2], sizes = [4, 1], strides = [1, 1]} : vector<4x4xf32> to vector<4x1xf32>
    %19 = vector.extract_strided_slice %2 {offsets = [2, 0], sizes = [1, 256], strides = [1, 1]} : vector<4x256xf32> to vector<1x256xf32>
    %20 = vector.broadcast %18 : vector<4x1xf32> to vector<4x256xf32>
    %21 = vector.broadcast %19 : vector<1x256xf32> to vector<4x256xf32>
    %22 = arith.mulf %20, %21 : vector<4x256xf32>
    %23 = arith.addf %17, %22 : vector<4x256xf32>
    %24 = vector.extract_strided_slice %4 {offsets = [0, 3], sizes = [4, 1], strides = [1, 1]} : vector<4x4xf32> to vector<4x1xf32>
    %25 = vector.extract_strided_slice %2 {offsets = [3, 0], sizes = [1, 256], strides = [1, 1]} : vector<4x256xf32> to vector<1x256xf32>
    %26 = vector.broadcast %24 : vector<4x1xf32> to vector<4x256xf32>
    %27 = vector.broadcast %25 : vector<1x256xf32> to vector<4x256xf32>
    %28 = arith.mulf %26, %27 : vector<4x256xf32>
    %29 = arith.addf %23, %28 : vector<4x256xf32>
    %30 = arith.divf %1, %29 : vector<4x256xf32>
    %c0_6 = arith.constant 0 : index
    %c0_7 = arith.constant 0 : index
    %c0_8 = arith.constant 0 : index
    %31 = vector.load %arg5[%c0_6, %c0_7, %c0_8] : memref<1x4x256xf32, #tpu.memory_space<vmem>>, vector<1x4x256xf32>
    %32 = vector.shape_cast %31 : vector<1x4x256xf32> to vector<4x256xf32>
    %33 = vector.shape_cast %30 : vector<4x256xf32> to vector<1x4x256xf32>
    tpu.vector_store %arg5[%c0_6, %c0_7, %c0_8], %33 {strides = array<i32>} : memref<1x4x256xf32, #tpu.memory_space<vmem>>, vector<1x4x256xf32>,
    return
  }
  func.func @transform_0(%arg0: i32, %arg1: i32) -> (i32, i32) {
    %c0_i32 = arith.constant 0 : i32
    %c0_i32_0 = arith.constant 0 : i32
    %c0_i32_1 = arith.constant 0 : i32
    return %c0_i32, %c0_i32_0 : i32, i32
  }
  func.func @transform_1(%arg0: i32, %arg1: i32) -> (i32, i32) {
    %c0_i32 = arith.constant 0 : i32
    %c0_i32_0 = arith.constant 0 : i32
    %c0_i32_1 = arith.constant 0 : i32
    return %c0_i32, %c0_i32_0 : i32, i32
  }
  func.func @transform_2(%arg0: i32, %arg1: i32) -> (i32, i32, i32) {
    %c0_i32 = arith.constant 0 : i32
    %c0_i32_0 = arith.constant 0 : i32
    return %arg0, %c0_i32, %arg1 : i32, i32, i32
  }
  func.func @transform_3(%arg0: i32, %arg1: i32) -> (i32, i32, i32) {
    %c0_i32 = arith.constant 0 : i32
    %c0_i32_0 = arith.constant 0 : i32
    return %arg0, %c0_i32, %arg1 : i32, i32, i32
  }
}

</mosaic_0001>

<bundles_post_ra>
// kernel: tpu_custom_call.1
= control target key start
LH: loop header
LB: loop body
LE: loop exit
PB: predicated region body
PF: predicated region fallthrough
CT: control target
= control target key end

     0   :  { %8 = vsyncpa [#allocation3], 0  ;;  %s799_s0 = inlined_call_operand.vmem [shape: f32[4,4], index: 0, kind: input, shape index: {}]   ;;  %s800_s1 = inlined_call_operand.vmem [shape: f32[4,1], index: 1, kind: input, shape index: {}]   ;;  %s801_s2 = inlined_call_operand.hbm [shape: f32[2,4,256], index: 2, kind: input, shape index: {}]   ;;  %s802_s3 = inlined_call_operand.hbm [shape: f32[2,4,256], index: 3, kind: output, shape index: {}]  }
   0x1   :  { %10 = vsyncpa [#allocation3 + $0x1], 0 }
   0x2   :  { %11 = vsyncpa [#allocation4], 0 }
   0x3   :  { %13 = vsyncpa [#allocation4 + $0x1], 0  ;;  %s655_s12 = smov 0   ;;  %s657_s13 = smov 0  }
   0x4   :  { %s659_s14 = smov 0   ;;  %s661_s15 = smov 0  }
   0x5   :  { %s663_s16 = smov 0   ;;  %s665_s17 = smov 0  }
   0x6 LB: > { %s430_s18 = sadd.s32 4294967295, %s627_s17   ;;  %s431_s19 = sadd.s32 4294967294, %s627_s17   ;;  %s627_s17 = sphi %s665_s17, %s19_s17   ;;  %s623_s16 = sphi %s663_s16, %s814_s16   ;;  %s619_s15 = sphi %s661_s15, %s813_s15   ;;  %s615_s14 = sphi %s659_s14, %s812_s14   ;;  %s611_s13 = sphi %s657_s13, %s811_s13   ;;  %s607_s12 = sphi %s655_s12, %s810_s12  }
   0x7   : > { %s31_s20 = sadd.s32 1, %s623_s16  ;;  %s82_s21 = sadd.s32 1, %s615_s14 }
   0x8   : > { %p33_p0 = scmp.ge.s32.totalorder %s31_s20, 2  ;;  %p89_p1 = scmp.ne.s32.totalorder %s615_s14, %s611_s13 }
   0x9   : > { %p90_p2 = scmp.eq.s32.totalorder %s627_s17, 0  ;;  %p95_p3 = scmp.ne.s32.totalorder %s611_s13, %s607_s12 }
   0xa   : > { %s816_s20 = smov (%p33_p0, %s31_s20), 0  ;;  %p96_p5 = scmp.eq.s32.totalorder %s430_s18, 0 }
   0xb   : > { %p696_p4 = por %p90_p2, %p89_p1  ;;  %s77_s23 = ssub.s32 %s623_s16, %s816_s20 }
   0xc   : > { %p121_p6 = scmp.eq.s32.totalorder %s430_s18, 1  ;;  %p80_p7 = scmp.eq.s32.totalorder %s77_s23, 0 }
   0xd   : > { %p702_p8 = por %p96_p5, %p95_p3  ;;  %p127_p10 = scmp.eq.s32.totalorder %s431_s19, 1 }
   0xe   : > { %p706_p9 = por %p121_p6, %p89_p1  ;;  %p459_p13 = scmp.lt.s32.totalorder %s627_s17, 2 }
   0xf   : > { %s711_s26 = scalar_select %p80_p7, %s615_s14, %s82_s21  }
  0x10   : > { %p713_p11 = por %p127_p10, %p95_p3  ;;  %s153_s28 = sand.u32 1, %s615_s14  }
  0x11   : > { %s434_s29 = sshll.u32 %s153_s28, 3  ;;  %s445_s30 = sshll.u32 %s623_s16, 7 }
  0x12   : > { %s806_s27 = scalar_select %p713_p11, 1, 0 }
  0x13   : > { %s165_s6 = scalar_lea.hbm %s801_s2, %s445_s30  ;;  %s157_s7 = scalar_lea.vmem [#allocation2], %s434_s29 }
  0x14   : > { %s167_s8 = sshll.u32 %s157_s7, 4  ;;  %p726_p0 = pnand %p459_p13, %p696_p4  ;;  %s168_s8 = int_to_ptr.vmem [resolvable:$true] %s167_s8 }
  0x15   : > { %p437_p1 = scmp.ge.s32.totalorder %s627_s17, 1  ;;  %p172_p2 = scmp.lt.s32.totalorder %s627_s17, 3 }
  0x16   : > { %s154_s10 = scalar_lea.sflag [#allocation3], %s153_s28  ;;  %p521_p3 = pneg %p726_p0 }
  0x17   : > { %s532_s11 = scalar_lea.vmem %s168_s8, 128  ;;  %s629_s18 = smov [#allocation2]  }
  0x18   : > { %p533_p5 = scmp.ne.s32.totalorder %s168_s8, %s532_s11  ;;  %s537_s19 = sshll.u32 %s629_s18, 4  ;;  %s538_s19 = int_to_ptr.vmem [resolvable:$false] %s537_s19 }
  0x19   : > { %s539_s21 = scalar_lea.vmem %s538_s19, 256  ;;  %p540_p10 = scmp.lt.s32.totalorder %s168_s8, %s538_s19 }
  0x1a   : > { %p535_p6 = pnand %p533_p5, %p521_p3  ;;  %p541_p12 = scmp.lt.s32.totalorder %s539_s21, %s532_s11 }
  0x1c   : > { %p536_p7 = pneg %p535_p6  ;;  %p542_p4 = por %p541_p12, %p540_p10 }
  0x1e   : > { %p543_p13 = pnand %p542_p4, %p536_p7 }
  0x20   : > { %546 = shalt.err (!%p543_p13)
}
  0x21   : > { %454 = dma.hbm_to_vmem [thread:$0]  (!%p726_p0), %s165_s6, 128, %s168_s8, %s154_s10  }
  0x22   : > { %p173_p11 = pnand %p437_p1, %p172_p2 }
  0x23   : > { %s741_s22 = sand.u32 (!%p173_p11), 1, %s611_s13  }
  0x24   : > { %176 = sbr.rel (%p173_p11) target bundleno = 212 (0xd4), region = 32  ;;  %s438_s23 = sshll.u32 (!%p173_p11), %s741_s22, 3 }
  0x25   : > { %s179_s28 = scalar_lea.sflag (!%p173_p11), [#allocation3], %s741_s22  ;;  %s182_s29 = scalar_lea.vmem (!%p173_p11), [#allocation2], %s438_s23 }
  0x29   : > { %598 = dma.done.wait (%p702_p8), %s179_s28, 128  }
  0x2a   : > { %600 = vsyncadd (%p702_p8), %s179_s28, 4294967168  ;;  %v630_v0 = vmov 0   ;;  %v631_v1 = vmov 1   ;;  %v210_v2 = vld [vmem:[%s799_s0] sm:$0xf]  ;;  %v632_v4 = vmov 2   ;;  %v217_v6 = vlaneseq }
  0x2b   : > { %513 = vset.pattern.permute.xlu0 %v630_v0  ;;  %514 = vset.pattern.permute.xlu1 %v631_v1  ;;  %v209_v3 = vld [vmem:[%s800_s1] sm:$0xf]  ;;  %v633_v5 = vmov 3   ;;  %s446_s24 = sshll.u32 %s619_s15, 7  ;;  %s204_s7 = scalar_lea.vmem [#allocation5], %s438_s23 }
  0x2c   : > { %213 = vperm.xlu0 %513, %v210_v2   ;;  %245 = vperm.xlu1 %514, %v210_v2   ;;  %v218_v7 = vshrl.u32 %v217_v6, 7  ;;  %v207_v8 = vld [vmem:[%s182_s29] sm:$0xff]  ;;  %s346_s8 = sshll.u32 %s204_s7, 4  ;;  %s344_s11 = scalar_lea.hbm %s802_s3, %s446_s24  ;;  %s347_s8 = int_to_ptr.vmem [resolvable:$true] %s346_s8 }
  0x2d   : > { %v208_v11 = vand.u32 2147483647, %v207_v8  ;;  %s330_s18 = scalar_lea.sflag [#allocation4], %s741_s22  ;;  %s547_s19 = scalar_lea.vmem %s347_s8, 128 }
  0x2e   : > { %v219_v9 = vsub.s32 0, %v218_v7  ;;  %v223_v10 = vsub.s32 4, %v218_v7  ;;  %v250_v12 = vsub.s32 1, %v218_v7  ;;  %v254_v13 = vsub.s32 5, %v218_v7  ;;  %p548_p8 = scmp.ne.s32.totalorder %s347_s8, %s547_s19  ;;  %s634_s21 = smov [#allocation5]  }
  0x2f   : > { %v276_v14 = vsub.s32 2, %v218_v7  ;;  %v280_v15 = vsub.s32 6, %v218_v7  ;;  %v302_v22 = vsub.s32 3, %v218_v7  ;;  %v306_v23 = vsub.s32 7, %v218_v7  ;;  %s551_s28 = sshll.u32 %s634_s21, 4  ;;  %s552_s28 = int_to_ptr.vmem [resolvable:$false] %s551_s28 }
  0x30   : > { %239 = vperm.xlu0 %513, %v209_v3   ;;  %515 = vset.pattern.permute.xlu1 %v632_v4  ;;  %v220_v16 = vrot.slane %v208_v11, %v219_v9  ;;  %v224_v17 = vrot.slane %v208_v11, %v223_v10  ;;  %v251_v18 = vrot.slane %v208_v11, %v250_v12  ;;  %p549_p11 = pnand %p548_p8, %p706_p9  ;;  %s553_s15 = scalar_lea.vmem %s552_s28, 256 }
  0x31   : > { %271 = vperm.xlu1 %515, %v210_v2   ;;  %v255_v19 = vrot.slane %v208_v11, %v254_v13  ;;  %v277_v20 = vrot.slane %v208_v11, %v276_v14  ;;  %v281_v21 = vrot.slane %v208_v11, %v280_v15  ;;  %v303_v32 = vrot.slane %v208_v11, %v302_v22  ;;  %p554_p0 = scmp.lt.s32.totalorder %s347_s8, %s552_s28  ;;  %p555_p1 = scmp.lt.s32.totalorder %s553_s15, %s547_s19 }
  0x32   : > { %v230_v24 = vrot.slane %v220_v16, %v219_v9  ;;  %v234_v25 = vrot.slane %v224_v17, %v219_v9  ;;  %v261_v28 = vrot.slane %v251_v18, %v250_v12  ;;  %v307_v33 = vrot.slane %v208_v11, %v306_v23  ;;  %p550_p12 = pneg %p549_p11 }
  0x33   : > { %v265_v29 = vrot.slane %v255_v19, %v250_v12  ;;  %v287_v30 = vrot.slane %v277_v20, %v276_v14  ;;  %v291_v31 = vrot.slane %v281_v21, %v276_v14  ;;  %v313_v44 = vrot.slane %v303_v32, %v302_v22  ;;  %p556_p2 = por %p555_p1, %p554_p0 }
  0x34   : > { %516 = vset.pattern.permute.xlu0 %v633_v5  ;;  %v317_v45 = vrot.slane %v307_v33, %v302_v22 }
  0x35   : > { %297 = vperm.xlu0 %516, %v210_v2   ;;  %p557_p3 = pnand %p556_p2, %p550_p12 }
  0xa7   : > { %v214_v26 = vpop.permute.xlu0 %213  ;;  %v246_v27 = vpop.permute.xlu1 %245 }
  0xa8   : > { %v235_v34 = vmul.f32 %v230_v24, %v214_v26  ;;  %v236_v35 = vmul.f32 %v234_v25, %v214_v26  ;;  %v266_v37 = vmul.f32 %v261_v28, %v246_v27  ;;  %v267_v38 = vmul.f32 %v265_v29, %v246_v27 }
  0xab   : > { %v240_v36 = vpop.permute.xlu0 %239 }
  0xac   : > { %v242_v39 = vadd.f32 %v240_v36, %v235_v34  ;;  %v243_v40 = vadd.f32 %v240_v36, %v236_v35  ;;  %v272_v41 = vpop.permute.xlu1 %271 }
  0xad   : > { %v292_v42 = vmul.f32 %v287_v30, %v272_v41  ;;  %v293_v43 = vmul.f32 %v291_v31, %v272_v41 }
  0xae   : > { %v268_v46 = vadd.f32 %v266_v37, %v242_v39  ;;  %v269_v47 = vadd.f32 %v267_v38, %v243_v40 }
  0xb0   : > { %v294_v48 = vadd.f32 %v292_v42, %v268_v46  ;;  %v295_v49 = vadd.f32 %v293_v43, %v269_v47  ;;  %v298_v50 = vpop.permute.xlu0 %297 }
  0xb1   : > { %v318_v51 = vmul.f32 %v313_v44, %v298_v50  ;;  %v319_v52 = vmul.f32 %v317_v45, %v298_v50 }
  0xb3   : > { %v320_v53 = vadd.f32 %v318_v51, %v294_v48  ;;  %v321_v54 = vadd.f32 %v319_v52, %v295_v49 }
  0xb5   : > { %v324_v55 = vcombine.low %v320_v53, %v321_v54 }
  0xb7   : > { %517 = vrcp.f32 %v324_v55 }
  0xc4   : > { %v518_v56 = vpop.eup %517 }
  0xc5   : > { %v327_v57 = vmul.f32 %v518_v56, %v207_v8 }
  0xc7   : > { %328 = vst [vmem:[%s204_s7] sm:$0xff] %v327_v57 }
  0xc8   : > { %560 = shalt.err (!%p557_p3)
}
  0xc9   : > { %s561_s23 = scalar_lea.hbm %s344_s11, 128  ;;  %s565_s30 = scalar_lea.hbm %s802_s3, 256 }
  0xca   : > { %p562_p5 = scmp.ne.s32.totalorder %s344_s11, %s561_s23  ;;  %p566_p10 = scmp.lt.s32.totalorder %s344_s11, %s802_s3 }
  0xcb   : > { %p567_p4 = scmp.lt.s32.totalorder %s565_s30, %s561_s23 }
  0xcc   : > { %p563_p6 = pnand %p562_p5, %p706_p9 }
  0xcd   : > { %p568_p13 = por %p567_p4, %p566_p10 }
  0xce   : > { %p564_p7 = pneg %p563_p6 }
  0xd0   : > { %p569_p8 = pnand %p568_p13, %p564_p7 }
  0xd2   : > { %572 = shalt.err (!%p569_p8)
}
  0xd3   : > { %449 = dma.vmem_to_hbm [thread:$0]  (%p706_p9), %s347_s8, 128, %s344_s11, %s330_s18  }
  0xd4 PF: > { %s358_s6 = sand.u32 1, %s607_s12   ;;  %p808_p11 = scmp.ne.s32.totalorder %s806_s27, 0 }
  0xd5   : > { %p809_p12 = scmp.ge.s32.totalorder %s627_s17, 2  ;;  %s359_s24 = scalar_lea.sflag [#allocation4], %s358_s6 }
  0xd7   : > { %p456_p0 = pnand %p809_p12, %p808_p11 }
  0xd9   : > { %p457_p1 = pneg %p456_p0 }
  0xdb   : > { %602 = dma.done.wait (%p457_p1), %s359_s24, 128  }
  0xdc   : > { %604 = vsyncadd (%p457_p1), %s359_s24, 4294967168  ;;  %s19_s17 = sadd.s32 1, %s627_s17   ;;  %s810_s12 = smov %s611_s13 }
  0xdd   : > { %p16_p2 = scmp.ge.s32.totalorder %s19_s17, 4   ;;  %s811_s13 = smov %s615_s14 }
  0xde   : > { %s812_s14 = smov %s711_s26  ;;  %s813_s15 = smov %s623_s16 }
  0xdf   : > { %s814_s16 = smov %s816_s20  ;;  %18 = sbr.rel (!%p16_p2) target bundleno = 6 (0x6), region = 77 }
  0xe4   :  { %364 = vsyncpa [#allocation3], 1 }
  0xe5   :  { %366 = vsyncpa [#allocation3 + $0x1], 1 }
  0xe6   :  { %367 = vsyncpa [#allocation4], 1 }
  0xe7   :  { %369 = vsyncpa [#allocation4 + $0x1], 1 }

</bundles_post_ra>
